<compile_context>
chip_gen: v7x
topology: tpu7x:2x2x1
jax: 0.10.0
libtpu: 0.0.40
codegen_flags: <defaults>
</compile_context>

<pallas_src>
import functools

import jax
import jax.numpy as jnp
from jax import lax
from jax.experimental import pallas as pl
from jax.experimental.pallas import tpu as pltpu


LANE = 128  # pad feature / hidden / class dims to lane-dense multiples of 128


def _round_up(x, m):
    return ((x + m - 1) // m) * m


def _pad2(a, rows, cols):
    r, c = a.shape
    return jnp.pad(a, ((0, rows - r), (0, cols - c)))


def _pad1(a, n):
    return jnp.pad(a, (0, n - a.shape[0]))


# ---------------------------------------------------------------------------
# Kernel 1: fused GCN layer   out = act( (A_hat @ X) @ W + b )
#   grid = (N // tm, N // tk): rows "parallel", contraction over N "arbitrary"
# ---------------------------------------------------------------------------

def _gcn_layer_kernel(a_ref, x_ref, w_ref, b_ref, o_ref, acc_ref, *, relu):
    k = pl.program_id(1)

    @pl.when(k == 0)
    def _():
        acc_ref[...] = jnp.zeros_like(acc_ref)

    # N^2 term: bf16 x bf16 MXU matmul, f32 accumulation in VMEM scratch.
    acc_ref[...] += jnp.dot(a_ref[...], x_ref[...].astype(jnp.bfloat16),
                            preferred_element_type=jnp.float32)

    @pl.when(k == pl.num_programs(1) - 1)
    def _():
        # Small fused epilogue: (tm, Fin) @ (Fin, Fout) + bias (+ ReLU), f32.
        h = jnp.dot(acc_ref[...], w_ref[...],
                    preferred_element_type=jnp.float32) + b_ref[...]
        if relu:
            h = jnp.maximum(h, 0.0)
        o_ref[...] = h.astype(o_ref.dtype)


def gcn_layer(a_hat_bf16, x, w_pad, b_pad, *, relu, tm=128, tk=128):
    n, fin = x.shape
    fout = w_pad.shape[1]
    assert n % tm == 0 and n % tk == 0, "N must be a multiple of the tile sizes"
    grid = (n // tm, n // tk)
    return pl.pallas_call(
        functools.partial(_gcn_layer_kernel, relu=relu),
        out_shape=jax.ShapeDtypeStruct((n, fout), jnp.float32),
        grid_spec=pltpu.PrefetchScalarGridSpec(
            num_scalar_prefetch=0,
            grid=grid,
            in_specs=[
                pl.BlockSpec((tm, tk), lambda i, k: (i, k)),      # A_hat tile (bf16)
                pl.BlockSpec((tk, fin), lambda i, k: (k, 0)),     # X tile
                pl.BlockSpec((fin, fout), lambda i, k: (0, 0)),   # W (resident)
                pl.BlockSpec((1, fout), lambda i, k: (0, 0)),     # b (resident)
            ],
            out_specs=pl.BlockSpec((tm, fout), lambda i, k: (i, 0)),
            scratch_shapes=[pltpu.VMEM((tm, fin), jnp.float32)],
        ),
        compiler_params=pltpu.CompilerParams(
            dimension_semantics=("parallel", "arbitrary"),
            vmem_limit_bytes=32 * 1024 * 1024,
        ),
    )(a_hat_bf16, x, w_pad, b_pad.reshape(1, -1))


# ---------------------------------------------------------------------------
# Kernel 2: fused Node_Cls head + NLL loss
#   grid = (N // tm,) "arbitrary" (SMEM loss accumulator revisited every step)
# ---------------------------------------------------------------------------

def _cls_loss_kernel(g_ref, w1_ref, b1_ref, w2_ref, b2_ref, gam_ref, bet_ref,
                     onehot_ref, pred_ref, loss_ref, *, c_real, n_total):
    i = pl.program_id(0)

    # Linear -> ReLU -> Linear (f32 MXU; tiny compared to the A_hat matmuls)
    h = jnp.dot(g_ref[...], w1_ref[...],
                preferred_element_type=jnp.float32) + b1_ref[...]
    h = jnp.maximum(h, 0.0)
    z = jnp.dot(h, w2_ref[...],
                preferred_element_type=jnp.float32) + b2_ref[...]

    c_pad = z.shape[-1]
    class_mask = lax.broadcasted_iota(jnp.int32, (1, c_pad), 1) < c_real

    # LayerNorm over the real c_real lanes only (biased variance, eps=1e-5)
    zm = jnp.where(class_mask, z, 0.0)
    mu = jnp.sum(zm, axis=-1, keepdims=True) * (1.0 / c_real)
    d = jnp.where(class_mask, z - mu, 0.0)
    var = jnp.sum(d * d, axis=-1, keepdims=True) * (1.0 / c_real)
    zn = (z - mu) * lax.rsqrt(var + 1e-5)
    pred = zn * gam_ref[...] + bet_ref[...]   # gamma/beta are zero in padded lanes
    pred_ref[...] = pred.astype(pred_ref.dtype)

    # log-softmax over the real lanes + per-tile NLL partial sum
    pm = jnp.where(class_mask, pred, jnp.float32(-1e30))
    m = jnp.max(pm, axis=-1, keepdims=True)
    e = jnp.where(class_mask, jnp.exp(pred - m), 0.0)
    lse = jnp.log(jnp.sum(e, axis=-1, keepdims=True)) + m
    log_probs = pred - lse                     # valid in real lanes, finite elsewhere
    partial = -jnp.sum(onehot_ref[...] * log_probs)

    @pl.when(i == 0)
    def _():
        loss_ref[0, 0] = 0.0

    loss_ref[0, 0] += partial

    @pl.when(i == pl.num_programs(0) - 1)
    def _():
        loss_ref[0, 0] = loss_ref[0, 0] * (1.0 / n_total)   # mean over *global* N


def node_cls_and_loss(g, w1_pad, b1_pad, w2_pad, b2_pad, gamma_pad, beta_pad,
                      onehot, *, c_real, tm=128):
    n, h_pad = g.shape
    c_pad = w2_pad.shape[1]
    assert n % tm == 0
    pred, loss = pl.pallas_call(
        functools.partial(_cls_loss_kernel, c_real=c_real, n_total=n),
        out_shape=(jax.ShapeDtypeStruct((n, c_pad), jnp.float32),
                   jax.ShapeDtypeStruct((1, 1), jnp.float32)),
        grid_spec=pltpu.PrefetchScalarGridSpec(
            num_scalar_prefetch=0,
            grid=(n // tm,),
            in_specs=[
                pl.BlockSpec((tm, h_pad), lambda i: (i, 0)),     # g tile
                pl.BlockSpec((h_pad, h_pad), lambda i: (0, 0)),  # W1
                pl.BlockSpec((1, h_pad), lambda i: (0, 0)),      # b1
                pl.BlockSpec((h_pad, c_pad), lambda i: (0, 0)),  # W2
                pl.BlockSpec((1, c_pad), lambda i: (0, 0)),      # b2
                pl.BlockSpec((1, c_pad), lambda i: (0, 0)),      # gamma
                pl.BlockSpec((1, c_pad), lambda i: (0, 0)),      # beta
                pl.BlockSpec((tm, c_pad), lambda i: (i, 0)),     # one-hot labels
            ],
            out_specs=(
                pl.BlockSpec((tm, c_pad), lambda i: (i, 0)),     # pred (lane-dense)
                pl.BlockSpec(memory_space=pltpu.MemorySpace.SMEM),  # loss scalar
            ),
        ),
        compiler_params=pltpu.CompilerParams(
            dimension_semantics=("arbitrary",),
            vmem_limit_bytes=32 * 1024 * 1024,
        ),
    )(g, w1_pad, b1_pad.reshape(1, -1), w2_pad, b2_pad.reshape(1, -1),
      gamma_pad.reshape(1, -1), beta_pad.reshape(1, -1), onehot)
    return pred, loss[0, 0]


# ---------------------------------------------------------------------------
# Glue: parameters, normalized adjacency, padding, full forward
# ---------------------------------------------------------------------------

def build_normalized_adjacency(edge_index, n):
    src, dst = edge_index
    a = jnp.zeros((n, n), jnp.float32)
    a = a.at[src, dst].set(1.0)
    a = a.at[dst, src].set(1.0)            # symmetrize
    a = a + jnp.eye(n, dtype=jnp.float32)  # self loops
    deg = jnp.sum(a, axis=1)
    d_inv_sqrt = jnp.where(deg > 0, lax.rsqrt(deg), 0.0)
    return a * d_inv_sqrt[:, None] * d_inv_sqrt[None, :]


def init_params(key, d, hidden, c):
    ks = jax.random.split(key, 8)

    def lin(kw, kb, fan_in, fan_out):
        bound = 1.0 / jnp.sqrt(jnp.float32(fan_in))
        w = jax.random.uniform(kw, (fan_in, fan_out), jnp.float32, -bound, bound)
        b = jax.random.uniform(kb, (fan_out,), jnp.float32, -bound, bound)
        return w, b

    p = {}
    p["gcn_w0"], p["gcn_b0"] = lin(ks[0], ks[1], d, hidden)
    p["gcn_w1"], p["gcn_b1"] = lin(ks[2], ks[3], hidden, hidden)
    p["cls_w1"], p["cls_b1"] = lin(ks[4], ks[5], hidden, hidden)
    p["cls_w2"], p["cls_b2"] = lin(ks[6], ks[7], hidden, c)
    p["ln_gamma"] = jnp.ones((c,), jnp.float32)
    p["ln_beta"] = jnp.zeros((c,), jnp.float32)
    return p


def pad_params(p, d, hidden, c):
    dp, hp, cp = _round_up(d, LANE), _round_up(hidden, LANE), _round_up(c, LANE)
    return {
        "gcn_w0": _pad2(p["gcn_w0"], dp, hp), "gcn_b0": _pad1(p["gcn_b0"], hp),
        "gcn_w1": _pad2(p["gcn_w1"], hp, hp), "gcn_b1": _pad1(p["gcn_b1"], hp),
        "cls_w1": _pad2(p["cls_w1"], hp, hp), "cls_b1": _pad1(p["cls_b1"], hp),
        "cls_w2": _pad2(p["cls_w2"], hp, cp), "cls_b2": _pad1(p["cls_b2"], cp),
        "ln_gamma": _pad1(p["ln_gamma"], cp), "ln_beta": _pad1(p["ln_beta"], cp),
    }


def base_forward(params_pad, x_pad, a_hat_bf16, onehot, c):
    # GCN backbone (2 layers, eval mode), both as (A @ X) @ W fused kernels.
    h = gcn_layer(a_hat_bf16, x_pad, params_pad["gcn_w0"], params_pad["gcn_b0"],
                  relu=True)
    g = gcn_layer(a_hat_bf16, h, params_pad["gcn_w1"], params_pad["gcn_b1"],
                  relu=False)
    # Node_Cls head + NLL loss fused.
    pred_pad, loss = node_cls_and_loss(
        g, params_pad["cls_w1"], params_pad["cls_b1"],
        params_pad["cls_w2"], params_pad["cls_b2"],
        params_pad["ln_gamma"], params_pad["ln_beta"], onehot, c_real=c)
    return loss, pred_pad[:, :c]


def base_forward_reference(params, x, a_hat_bf16, labels):
    # Same bf16 quantization of the N^2 matmul inputs as the kernel path.
    a = a_hat_bf16.astype(jnp.float32)

    def q(t):
        return t.astype(jnp.bfloat16).astype(jnp.float32)

    h = jnp.maximum((a @ q(x)) @ params["gcn_w0"] + params["gcn_b0"], 0.0)
    g = (a @ q(h)) @ params["gcn_w1"] + params["gcn_b1"]
    h2 = jnp.maximum(g @ params["cls_w1"] + params["cls_b1"], 0.0)
    z = h2 @ params["cls_w2"] + params["cls_b2"]
    mu = jnp.mean(z, axis=-1, keepdims=True)
    var = jnp.mean((z - mu) ** 2, axis=-1, keepdims=True)
    pred = (z - mu) * lax.rsqrt(var + 1e-5) * params["ln_gamma"] + params["ln_beta"]
    lp = jax.nn.log_softmax(pred, axis=1)
    loss = -jnp.mean(lp[jnp.arange(pred.shape[0]), labels])
    return loss, pred


if __name__ == "__main__":
    N, D, HIDDEN, C = 256, 8, 32, 4          # N multiple of the 128 row/contraction tiles

    key = jax.random.PRNGKey(0)
    k_feat, k_lab, k_param = jax.random.split(key, 3)

    x = jax.random.normal(k_feat, (N, D), jnp.float32)            # node_feat
    labels = jax.random.randint(k_lab, (N,), 0, C, jnp.int32)     # data.label.squeeze(1)
    # deterministic ring graph edge_index
    src = jnp.arange(N, dtype=jnp.int32)
    dst = (src + 1) % N
    edge_index = jnp.stack([src, dst], axis=0)

    a_hat = build_normalized_adjacency(edge_index, N)
    a_hat_bf16 = a_hat.astype(jnp.bfloat16)          # only O(N^2) array -> bf16

    params = init_params(k_param, D, HIDDEN, C)
    params_pad = pad_params(params, D, HIDDEN, C)

    d_pad = _round_up(D, LANE)
    c_pad = _round_up(C, LANE)
    x_pad = _pad2(x, N, d_pad)
    onehot = jax.nn.one_hot(labels, c_pad, dtype=jnp.float32)     # lane-dense labels

    loss, pred = base_forward(params_pad, x_pad, a_hat_bf16, onehot, C)
    jax.block_until_ready((loss, pred))

    loss_ref, pred_ref = base_forward_reference(params, x, a_hat_bf16, labels)
    assert jnp.allclose(pred, pred_ref, atol=1e-3, rtol=1e-3), "pred mismatch"
    assert jnp.allclose(loss, loss_ref, atol=1e-3, rtol=1e-3), "loss mismatch"

    print("KERNEL_OK")
</pallas_src>

<mosaic_0001>
module attributes {stable_mosaic.version = 11 : i64} {
  func.func @_gcn_layer_kernel(%arg0: i32, %arg1: i32, %arg2: memref<128x128xbf16, #tpu.memory_space<vmem>>, %arg3: memref<128x128xf32, #tpu.memory_space<vmem>>, %arg4: memref<128x128xf32, #tpu.memory_space<vmem>>, %arg5: memref<1x128xf32, #tpu.memory_space<vmem>>, %arg6: memref<128x128xf32, #tpu.memory_space<vmem>>, %arg7: memref<128x128xf32, #tpu.memory_space<vmem>>) attributes {dimension_semantics = [#tpu.dimension_semantics<parallel>, #tpu.dimension_semantics<arbitrary>], iteration_bounds = array<i64: 2, 2>, scalar_prefetch = 0 : i64, scratch_operands = 1 : i64, tpu.core_type = #tpu.core_type<tc>, window_params = [{transform_indices = @transform_0, window_bounds = array<i64: 128, 128>}, {transform_indices = @transform_1, window_bounds = array<i64: 128, 128>}, {pipeline_mode = #tpu.pipeline_mode<synchronous>, transform_indices = @transform_2, window_bounds = array<i64: 128, 128>}, {pipeline_mode = #tpu.pipeline_mode<synchronous>, transform_indices = @transform_3, window_bounds = array<i64: 1, 128>}, {transform_indices = @transform_4, window_bounds = array<i64: 128, 128>}]} {
    %c0_i32 = arith.constant 0 : i32
    %0 = arith.cmpi eq, %arg1, %c0_i32 : i32
    %1 = arith.extui %0 : i1 to i32
    %c0_i32_0 = arith.constant 0 : i32
    %2 = arith.cmpi ne, %1, %c0_i32_0 : i32
    scf.if %2 {
      %cst_9 = arith.constant 0.000000e+00 : f32
      %13 = vector.broadcast %cst_9 : f32 to vector<128x128xf32>
      %c0_10 = arith.constant 0 : index
      %c0_11 = arith.constant 0 : index
      %14 = vector.load %arg7[%c0_10, %c0_11] : memref<128x128xf32, #tpu.memory_space<vmem>>, vector<128x128xf32>
      tpu.vector_store %arg7[%c0_10, %c0_11], %13 {strides = array<i32>} : memref<128x128xf32, #tpu.memory_space<vmem>>, vector<128x128xf32>,
    } else {
    }
    %c0 = arith.constant 0 : index
    %c0_1 = arith.constant 0 : index
    %3 = vector.load %arg7[%c0, %c0_1] : memref<128x128xf32, #tpu.memory_space<vmem>>, vector<128x128xf32>
    %c0_2 = arith.constant 0 : index
    %c0_3 = arith.constant 0 : index
    %4 = vector.load %arg2[%c0_2, %c0_3] : memref<128x128xbf16, #tpu.memory_space<vmem>>, vector<128x128xbf16>
    %c0_4 = arith.constant 0 : index
    %c0_5 = arith.constant 0 : index
    %5 = vector.load %arg3[%c0_4, %c0_5] : memref<128x128xf32, #tpu.memory_space<vmem>>, vector<128x128xf32>
    %6 = arith.truncf %5 : vector<128x128xf32> to vector<128x128xbf16>
    %cst = arith.constant dense<0.000000e+00> : vector<128x128xf32>
    %7 = tpu.matmul %4, %6, %cst {dimension_numbers = #tpu.dot_dimension_numbers<[1], [0], [0], [1], [0, 0, 1, 1], [], []>} : vector<128x128xbf16>, vector<128x128xbf16>, vector<128x128xf32> -> vector<128x128xf32>
    %8 = arith.addf %3, %7 : vector<128x128xf32>
    %c0_6 = arith.constant 0 : index
    %c0_7 = arith.constant 0 : index
    %9 = vector.load %arg7[%c0_6, %c0_7] : memref<128x128xf32, #tpu.memory_space<vmem>>, vector<128x128xf32>
    tpu.vector_store %arg7[%c0_6, %c0_7], %8 {strides = array<i32>} : memref<128x128xf32, #tpu.memory_space<vmem>>, vector<128x128xf32>,
    %c1_i32 = arith.constant 1 : i32
    %10 = arith.cmpi eq, %arg1, %c1_i32 : i32
    %11 = arith.extui %10 : i1 to i32
    %c0_i32_8 = arith.constant 0 : i32
    %12 = arith.cmpi ne, %11, %c0_i32_8 : i32
    scf.if %12 {
      %c0_9 = arith.constant 0 : index
      %c0_10 = arith.constant 0 : index
      %13 = vector.load %arg7[%c0_9, %c0_10] : memref<128x128xf32, #tpu.memory_space<vmem>>, vector<128x128xf32>
      %c0_11 = arith.constant 0 : index
      %c0_12 = arith.constant 0 : index
      %14 = vector.load %arg4[%c0_11, %c0_12] : memref<128x128xf32, #tpu.memory_space<vmem>>, vector<128x128xf32>
      %cst_13 = arith.constant dense<0.000000e+00> : vector<128x128xf32>
      %15 = tpu.matmul %13, %14, %cst_13 {dimension_numbers = #tpu.dot_dimension_numbers<[1], [0], [0], [1], [0, 0, 1, 1], [], []>} : vector<128x128xf32>, vector<128x128xf32>, vector<128x128xf32> -> vector<128x128xf32>
      %c0_14 = arith.constant 0 : index
      %c0_15 = arith.constant 0 : index
      %16 = vector.load %arg5[%c0_14, %c0_15] : memref<1x128xf32, #tpu.memory_space<vmem>>, vector<1x128xf32>
      %17 = vector.broadcast %16 : vector<1x128xf32> to vector<128x128xf32>
      %18 = arith.addf %15, %17 : vector<128x128xf32>
      %cst_16 = arith.constant 0.000000e+00 : f32
      %19 = vector.broadcast %cst_16 : f32 to vector<128x128xf32>
      %20 = arith.maximumf %18, %19 : vector<128x128xf32>
      %c0_17 = arith.constant 0 : index
      %c0_18 = arith.constant 0 : index
      %21 = vector.load %arg6[%c0_17, %c0_18] : memref<128x128xf32, #tpu.memory_space<vmem>>, vector<128x128xf32>
      tpu.vector_store %arg6[%c0_17, %c0_18], %20 {strides = array<i32>} : memref<128x128xf32, #tpu.memory_space<vmem>>, vector<128x128xf32>,
    } else {
    }
    return
  }
  func.func @transform_0(%arg0: i32, %arg1: i32) -> (i32, i32) {
    %c0_i32 = arith.constant 0 : i32
    return %arg0, %arg1 : i32, i32
  }
  func.func @transform_1(%arg0: i32, %arg1: i32) -> (i32, i32) {
    %c0_i32 = arith.constant 0 : i32
    %c0_i32_0 = arith.constant 0 : i32
    return %arg1, %c0_i32 : i32, i32
  }
  func.func @transform_2(%arg0: i32, %arg1: i32) -> (i32, i32) {
    %c0_i32 = arith.constant 0 : i32
    %c0_i32_0 = arith.constant 0 : i32
    %c0_i32_1 = arith.constant 0 : i32
    return %c0_i32, %c0_i32_0 : i32, i32
  }
  func.func @transform_3(%arg0: i32, %arg1: i32) -> (i32, i32) {
    %c0_i32 = arith.constant 0 : i32
    %c0_i32_0 = arith.constant 0 : i32
    %c0_i32_1 = arith.constant 0 : i32
    return %c0_i32, %c0_i32_0 : i32, i32
  }
  func.func @transform_4(%arg0: i32, %arg1: i32) -> (i32, i32) {
    %c0_i32 = arith.constant 0 : i32
    %c0_i32_0 = arith.constant 0 : i32
    return %arg0, %c0_i32 : i32, i32
  }
}

</mosaic_0001>

<bundles_post_ra>
// kernel: tpu_custom_call.1
= control target key start
LH: loop header
LB: loop body
LE: loop exit
PB: predicated region body
PF: predicated region fallthrough
CT: control target
= control target key end

     0   :  { %s1996_s0 = inlined_call_operand.hbm [shape: bf16[256,256], index: 0, kind: input, shape index: {}]   ;;  %s1997_s1 = inlined_call_operand.hbm [shape: f32[256,128], index: 1, kind: input, shape index: {}]   ;;  %s1998_s2 = inlined_call_operand.hbm [shape: f32[128,128], index: 2, kind: input, shape index: {}]   ;;  %s1999_s3 = inlined_call_operand.vmem [shape: f32[1,128], index: 3, kind: input, shape index: {}]   ;;  %s2000_s4 = inlined_call_operand.hbm [shape: f32[256,128], index: 4, kind: output, shape index: {}]  }
   0x1   :  { %2023 = sst [smem:[#allocation23_spill]] %s1996_s0 }
   0x2   :  { %2024 = sst [smem:[#allocation24_spill]] %s1998_s2 }
   0x3   :  { %2025 = sst [smem:[#allocation25_spill]] %s1999_s3 }
   0x4   :  { %2026 = sst [smem:[#allocation26_spill]] %s2000_s4 }
   0x5   :  { %9 = vsyncpa [#allocation4], 0 }
   0x6   :  { %11 = vsyncpa [#allocation4 + $0x1], 0 }
   0x7   :  { %12 = vsyncpa [#allocation7], 0 }
   0x8   :  { %14 = vsyncpa [#allocation7 + $0x1], 0 }
   0x9   :  { %15 = vsyncpa [#allocation5], 0 }
   0xa   :  { %17 = vsyncpa [#allocation5 + $0x1], 0  ;;  %s1568_s15 = smov 0   ;;  %s1570_s16 = smov 0  }
   0xb   :  { %s1572_s17 = smov 0   ;;  %s1574_s18 = smov 0  }
   0xc   :  { %s1576_s19 = smov 0   ;;  %s1578_s20 = smov 0  }
   0xd   :  { %s1580_s21 = smov 0   ;;  %s1582_s22 = smov 0  }
   0xe   :  { %s1584_s23 = smov 0   ;;  %s1586_s24 = smov 0  }
   0xf   :  { %s1588_s25 = smov 0   ;;  %s1590_s26 = smov 0  }
  0x10   :  { %s1592_s27 = smov 0   ;;  %s1594_s28 = smov 0  }
  0x11 LB: > { %2027 = sst [smem:[#allocation14_spill]] %s1478_s15  ;;  %s1635_s29 = sadd.s32 4294967295, %s1530_s28   ;;  %s1530_s28 = sphi %s1594_s28, %s23_s28   ;;  %s1526_s27 = sphi %s1592_s27, %s2087_s27   ;;  %s1522_s26 = sphi %s1590_s26, %s2086_s26   ;;  %s1518_s25 = sphi %s1588_s25, %s2085_s25   ;;  %s1514_s24 = sphi %s1586_s24, %s2084_s24   ;;  %s1510_s23 = sphi %s1584_s23, %s2083_s23   ;;  %s1506_s22 = sphi %s1582_s22, %s2082_s22   ;;  %s1502_s21 = sphi %s1580_s21, %s2081_s21   ;;  %s1498_s20 = sphi %s1578_s20, %s2080_s20   ;;  %s1494_s19 = sphi %s1576_s19, %s2079_s19   ;;  %s1490_s18 = sphi %s1574_s18, %s2078_s18   ;;  %s1486_s17 = sphi %s1572_s17, %s2077_s17   ;;  %s1482_s16 = sphi %s1570_s16, %s2076_s16   ;;  %s1478_s15 = sphi %s1568_s15, %s2073_s15  }
  0x12   : > { %2028 = sst [smem:[#allocation15_spill]] %s1482_s16  ;;  %s896_s30 = sadd.s32 4294967294, %s1530_s28  }
  0x13   : > { %2029 = sst [smem:[#allocation16_spill]] %s1514_s24  ;;  %p57_p0 = scmp.ne.s32.totalorder %s1506_s22, %s1502_s21 }
  0x14   : > { %2030 = sst [smem:[#allocation17_spill]] %s1518_s25  ;;  %p2003_p1 = scmp.eq.s32.totalorder %s1635_s29, 0 }
  0x15   : > { %2031 = sst [smem:[#allocation18_spill]] %s1635_s29  ;;  %p83_p2 = scmp.ne.s32.totalorder %s1494_s19, %s1490_s18 }
  0x16   : > { %p1644_p3 = por %p2003_p1, %p57_p0  ;;  %p148_p4 = scmp.ne.s32.totalorder %s1486_s17, %s1482_s16 }
  0x17   : > { %p1652_p5 = por %p83_p2, %p2003_p1  ;;  %p149_p6 = scmp.eq.s32.totalorder %s1635_s29, 3 }
  0x18   : > { %s2032_s6 = scalar_select %p1644_p3, 1, 0 }
  0x19   : > { %s2033_s7 = scalar_select %p1652_p5, 1, 0 }
  0x1a   : > { %p154_p7 = scmp.ne.s32.totalorder %s1482_s16, %s1478_s15  ;;  %p155_p8 = scmp.eq.s32.totalorder %s896_s30, 3 }
  0x1b   : > { %2034 = sst [smem:[#allocation19_spill]] %s2033_s7  ;;  %p1659_p9 = por %p149_p6, %p148_p4 }
  0x1c   : > { %p897_p10 = scmp.ge.s32.totalorder %s1530_s28, 1  ;;  %p1664_p11 = por %p155_p8, %p154_p7 }
  0x1d   : > { %s2035_s8 = scalar_select %p1659_p9, 1, 0 }
  0x1e   : > { %s2037_s9 = scalar_select %p1664_p11, 1, 0 }
  0x1f   : > { %2036 = sst [smem:[#allocation20_spill]] %s2035_s8  ;;  %p162_p12 = scmp.lt.s32.totalorder %s1530_s28, 5 }
  0x20   : > { %2038 = sst [smem:[#allocation21_spill]] %s2037_s9  ;;  %s1532_s11 = smov [#allocation8]  }
  0x21   : > { %p1669_p13 = pnand %p897_p10, %p162_p12  ;;  %s174_s12 = sshll.u32 %s1532_s11, 4  ;;  %s175_s12 = int_to_ptr.vmem [resolvable:$true] %s174_s12 }
  0x22   : > { %s2041_s2 = sld [smem:[#allocation24_spill]] }
  0x23   : > { %s2039_s10 = scalar_select %p1669_p13, 1, 0 }
  0x24   : > { %p1141_p0 = pneg %p1669_p13 }
  0x26   : > { %p1677_p2 = pnand %p1141_p0, %p2003_p1 }
  0x28   : > { %s1288_s21 = scalar_lea.hbm %s2041_s2, 2048  ;;  %p1290_p6 = pneg %p1677_p2 }
  0x29   : > { %p1289_p4 = scmp.ne.s32.totalorder %s2041_s2, %s1288_s21  ;;  %p1295_p10 = scmp.lt.u32.totalorder %s1288_s21, %s2041_s2 }
  0x2b   : > { %p1291_p7 = pnand %p1290_p6, %p1289_p4 }
  0x2d   : > { %p1292_p8 = pneg %p1291_p7 }
  0x2f   : > { %p1297_p12 = pnand %p1295_p10, %p1292_p8 }
  0x31   : > { %1300 = shalt.err (!%p1297_p12)
}
  0x32   : > { %s1301_s15 = scalar_lea.vmem %s175_s12, 2048  ;;  %p1309_p9 = scmp.lt.s32.totalorder %s175_s12, %s175_s12 }
  0x33   : > { %p1302_p0 = scmp.ne.s32.totalorder %s175_s12, %s1301_s15  ;;  %p1310_p5 = scmp.lt.s32.totalorder %s1301_s15, %s1301_s15 }
  0x35   : > { %p1304_p1 = pnand %p1302_p0, %p1290_p6  ;;  %p1311_p3 = por %p1310_p5, %p1309_p9 }
  0x37   : > { %p1305_p11 = pneg %p1304_p1 }
  0x39   : > { %p1312_p13 = pnand %p1311_p3, %p1305_p11 }
  0x3b   : > { %1315 = shalt.err (!%p1312_p13)
}
  0x3c   : > { %s2009_s5 = smov 128   ;;  %s2008_s9 = smov 8  }
  0x3d   : > { %1144 = dma.hbm_to_vmem [thread:$0]  (!%p1677_p2), %s2041_s2, 2048, %s175_s12, [#allocation7], %s2009_s5, %s2009_s5, %s2008_s9  }
  0x3e   : > { %s32_s18 = sadd.s32 1, %s1522_s26  ;;  %s35_s21 = sadd.s32 1, %s1526_s27 }
  0x3f   : > { %p33_p1 = scmp.ge.s32.totalorder %s32_s18, 2  ;;  %s44_s30 = sadd.s32 1, %s1510_s23 }
  0x40   : > { %p51_p3 = scmp.ne.s32.totalorder %s1510_s23, %s1506_s22  ;;  %p2022_p5 = scmp.eq.s32.totalorder %s1530_s28, 0 }
  0x41   : > { %s2089_s18 = smov (%p33_p1, %s32_s18), 0  ;;  %s2091_s21 = smov (!%p33_p1, %s35_s21), %s1526_s27 }
  0x42   : > { %2042 = sst [smem:[#allocation22_spill]] %s2089_s18  ;;  %s1710_s13 = ssub.s32 %s1522_s26, %s2089_s18 }
  0x43   : > { %p37_p9 = scmp.ge.s32.totalorder %s2091_s21, 2  ;;  %p68_p11 = scmp.eq.s32.totalorder %s1710_s13, 0 }
  0x44   : > { %p1716_p13 = por %p2022_p5, %p51_p3  ;;  %p2021_p2 = scmp.lt.s32.totalorder %s1530_s28, 4 }
  0x45   : > { %s2093_s21 = smov (%p37_p9, %s2091_s21), 0  ;;  %s191_s11 = sand.u32 1, %s1510_s23  }
  0x46   : > { %s928_s15 = sshll.u32 %s1526_s27, 5  ;;  %s39_s14 = ssub.s32 %s1526_s27, %s2093_s21 }
  0x47   : > { %s41_s9 = sor.u32 %s1710_s13, %s39_s14  ;;  %p136_p4 = scmp.eq.s32.totalorder %s39_s14, 0 }
  0x48   : > { %p42_p6 = scmp.eq.s32.totalorder %s41_s9, 0  ;;  %s900_s5 = sshll.u32 %s191_s11, 6 }
  0x49   : > { %s2044_s2 = sadd.s32 1, %s1486_s17  ;;  %s201_s8 = sadd.s32 %s1522_s26, %s928_s15 }
  0x4a   : > { %s1731_s18 = scalar_select %p136_p4, %s1486_s17, %s2044_s2  }
  0x4b   : > { %s1734_s4 = scalar_select %p42_p6, %s1510_s23, %s44_s30  }
  0x4c   : > { %s903_s25 = sshll.u32 %s201_s8, 6  ;;  %s195_s3 = scalar_lea.vmem [#allocation3], %s900_s5 }
  0x4d   : > { %s204_s24 = sshll.u32 %s195_s3, 4  ;;  %s2045_s0 = sld [smem:[#allocation23_spill]]  ;;  %s1742_s24 = int_to_ptr.vmem [resolvable:$true] %s204_s24 }
  0x4e   : > { %p1748_p7 = pnand %p2021_p2, %p1716_p13  ;;  %s1752_s3 = scalar_lea.sflag [#allocation4], %s191_s11 }
  0x50   : > { %p1318_p10 = pneg %p1748_p7 }
  0x53   : > { %s1740_s29 = scalar_lea.hbm %s2045_s0, %s903_s25  ;;  %s1321_s7 = scalar_lea.hbm %s2045_s0, 4096 }
  0x54   : > { %s1316_s8 = scalar_lea.hbm %s1740_s29, 1024  ;;  %p1322_p1 = scmp.lt.u32.totalorder %s1740_s29, %s2045_s0 }
  0x55   : > { %p1317_p8 = scmp.ne.s32.totalorder %s1740_s29, %s1316_s8  ;;  %p1323_p3 = scmp.lt.u32.totalorder %s1321_s7, %s1316_s8 }
  0x56   : > { %p1325_p13 = scmp.lt.u32.totalorder %s1316_s8, %s1740_s29 }
  0x57   : > { %p1319_p12 = pnand %p1318_p10, %p1317_p8  ;;  %p1324_p9 = por %p1323_p3, %p1322_p1 }
  0x59   : > { %p1320_p0 = pneg %p1319_p12  ;;  %p1326_p4 = por %p1325_p13, %p1324_p9 }
  0x5b   : > { %p1327_p6 = pnand %p1326_p4, %p1320_p0 }
  0x5d   : > { %1330 = shalt.err (!%p1327_p6)
}
  0x5e   : > { %s1331_s30 = scalar_lea.vmem %s1742_s24, 1024  ;;  %s1535_s12 = smov [#allocation3]  }
  0x5f   : > { %p1332_p8 = scmp.ne.s32.totalorder %s1742_s24, %s1331_s30  ;;  %s1336_s11 = sshll.u32 %s1535_s12, 4  ;;  %s1337_s11 = int_to_ptr.vmem [resolvable:$false] %s1336_s11 }
  0x60   : > { %s1338_s15 = scalar_lea.vmem %s1337_s11, 2048  ;;  %p1339_p5 = scmp.lt.s32.totalorder %s1742_s24, %s1337_s11 }
  0x61   : > { %p1334_p12 = pnand %p1332_p8, %p1318_p10  ;;  %p1340_p1 = scmp.lt.s32.totalorder %s1338_s15, %s1331_s30 }
  0x63   : > { %p1335_p2 = pneg %p1334_p12  ;;  %p1341_p3 = por %p1340_p1, %p1339_p5 }
  0x65   : > { %p1342_p9 = pnand %p1341_p3, %p1335_p2 }
  0x67   : > { %1345 = shalt.err (!%p1342_p9)
}
  0x68   : > { %s1536_s14 = smov 64   ;;  %s1537_s8 = smov 4  }
  0x69   : > { %s2047_s16 = smov 128   ;;  %s70_s25 = sadd.s32 1, %s1498_s20 }
  0x6a   : > { %1148 = dma.hbm_to_vmem [thread:$0]  (!%p1748_p7), %s1740_s29, 1024, %s1742_s24, %s1752_s3, %s2047_s16, %s1536_s14, %s1537_s8  }
  0x6b   : > { %p77_p5 = scmp.ne.s32.totalorder %s1498_s20, %s1494_s19  ;;  %p2048_p2 = scmp.eq.s32.totalorder %s1530_s28, 0 }
  0x6c   : > { %s1787_s7 = scalar_select %p68_p11, %s1498_s20, %s70_s25  }
  0x6d   : > { %p79_p10 = por %p77_p5, %p2048_p2  ;;  %s214_s5 = sand.u32 1, %s1530_s28  }
  0x6e   : > { %s216_s9 = sand.u32 1, %s1498_s20   ;;  %s929_s12 = sshll.u32 %s1522_s26, 11 }
  0x6f   : > { %s904_s30 = sshll.u32 %s216_s9, 7  ;;  %s1797_s0 = scalar_lea.hbm %s1997_s1, %s929_s12 }
  0x70   : > { %s218_s24 = scalar_lea.vmem [#allocation6], %s904_s30  ;;  %p2049_p7 = scmp.lt.s32.totalorder %s1530_s28, 4 }
  0x71   : > { %s225_s29 = sshll.u32 %s218_s24, 4  ;;  %s1807_s2 = scalar_lea.sflag [#allocation7], %s214_s5  ;;  %s1805_s29 = int_to_ptr.vmem [resolvable:$true] %s225_s29 }
  0x72   : > { %p1801_p11 = pnand %p2049_p7, %p79_p10  ;;  %s1346_s3 = scalar_lea.hbm %s1797_s0, 2048 }
  0x73   : > { %p1347_p0 = scmp.ne.s32.totalorder %s1797_s0, %s1346_s3  ;;  %s1351_s25 = scalar_lea.hbm %s1997_s1, 4096 }
  0x74   : > { %p1348_p13 = pneg %p1801_p11  ;;  %p1352_p8 = scmp.lt.u32.totalorder %s1797_s0, %s1997_s1 }
  0x75   : > { %p1353_p12 = scmp.lt.u32.totalorder %s1351_s25, %s1346_s3  ;;  %p1355_p3 = scmp.lt.u32.totalorder %s1346_s3, %s1797_s0 }
  0x76   : > { %p1349_p4 = pnand %p1348_p13, %p1347_p0 }
  0x77   : > { %p1354_p1 = por %p1353_p12, %p1352_p8 }
  0x78   : > { %p1350_p6 = pneg %p1349_p4 }
  0x79   : > { %p1356_p9 = por %p1355_p3, %p1354_p1 }
  0x7b   : > { %p1357_p5 = pnand %p1356_p9, %p1350_p6 }
  0x7d   : > { %1360 = shalt.err (!%p1357_p5)
}
  0x7e   : > { %s1361_s5 = scalar_lea.vmem %s1805_s29, 2048  ;;  %s1538_s12 = smov [#allocation6]  }
  0x7f   : > { %p1362_p2 = scmp.ne.s32.totalorder %s1805_s29, %s1361_s5  ;;  %s1366_s11 = sshll.u32 %s1538_s12, 4  ;;  %s1367_s11 = int_to_ptr.vmem [resolvable:$false] %s1366_s11 }
  0x80   : > { %s1368_s15 = scalar_lea.vmem %s1367_s11, 4096  ;;  %p1369_p0 = scmp.lt.s32.totalorder %s1805_s29, %s1367_s11 }
  0x81   : > { %p1364_p10 = pnand %p1362_p2, %p1348_p13  ;;  %p1370_p4 = scmp.lt.s32.totalorder %s1368_s15, %s1361_s5 }
  0x83   : > { %p1365_p7 = pneg %p1364_p10  ;;  %p1371_p8 = por %p1370_p4, %p1369_p0 }
  0x85   : > { %p1372_p12 = pnand %p1371_p8, %p1365_p7 }
  0x87   : > { %1375 = shalt.err (!%p1372_p12)
}
  0x88   : > { %s2051_s24 = smov 8   ;;  %p2052_p13 = scmp.ne.s32.totalorder %s2039_s10, 0 }
  0x89   : > { %1151 = dma.hbm_to_vmem [thread:$0]  (!%p1801_p11), %s1797_s0, 2048, %s1805_s29, %s1807_s2, %s2047_s16, %s2047_s16, %s2051_s24  }
  0x8a   : > { %237 = sbr.rel (%p2052_p13) target bundleno = 698 (0x2ba), region = 36  ;;  %s239_s3 = sand.u32 (!%p2052_p13), 1, %s1506_s22  }
  0x8b   : > { %s908_s14 = sshll.u32 (!%p2052_p13), %s239_s3, 6  ;;  %s240_s8 = scalar_lea.sflag (!%p2052_p13), [#allocation4], %s239_s3 }
  0x8c   : > { %s1841_s25 = scalar_lea.vmem (!%p2052_p13), [#allocation3], %s908_s14  ;;  %p2053_p6 = scmp.ne.s32.totalorder (!%p2052_p13), %s2032_s6, 0 }
  0x91   : > { %1461 = dma.done.wait (%p2053_p6), %s240_s8, 1024  }
  0x92   : > { %1463 = vsyncadd (%p2053_p6), %s240_s8, 4294966272  ;;  %s2054_s13 = sld [smem:[#allocation18_spill]]  ;;  %s2055_s9 = sld [smem:[#allocation19_spill]] }
  0x93   : > { %s250_s0 = sand.u32 1, %s1494_s19  }
  0x94   : > { %s909_s16 = sshll.u32 %s250_s0, 7 }
  0x95   : > { %s1849_s29 = scalar_lea.vmem [#allocation6], %s909_s16 }
  0x98   : > { %s248_s30 = sand.u32 1, %s2054_s13   ;;  %p2056_p11 = scmp.ne.s32.totalorder %s2055_s9, 0 }
  0x99   : > { %s249_s10 = scalar_lea.sflag [#allocation7], %s248_s30 }
  0x9a   : > { %1465 = dma.done.wait (%p2056_p11), %s249_s10, 2048  }
  0x9b   : > { %1467 = vsyncadd (%p2056_p11), %s249_s10, 4294965248  ;;  %p2057_p1 = scmp.eq.s32.totalorder %s2054_s13, 0 }
  0x9d   : > { %1469 = dma.done.wait (%p2057_p1), [#allocation7], 2048   ;;  %p2058_p3 = pmov %p2057_p1 }
  0x9e   : > { %s2059_s6 = sld [smem:[#allocation15_spill]]  ;;  %s2060_s11 = sld [smem:[#allocation16_spill]] }
  0x9f   : > { %1471 = vsyncadd (%p2058_p3), [#allocation7], 4294965248 }
  0xa4   : > { %s283_s2 = sand.u32 1, %s2059_s6   ;;  %p912_p9 = scmp.ne.s32.totalorder %s2060_s11, 0 }
  0xa5   : > { %s911_s5 = sshll.u32 %s283_s2, 7  ;;  %v1539_v0 = vmov (!%p912_p9), 0.0  }
  0xa6   : > { %s1862_s12 = scalar_lea.vmem [#allocation9], %s911_s5  ;;  %293 = sbr.rel (%p912_p9) target bundleno = 174 (0xae), region = 52  ;;  %294 = vst [vmem:[#allocation2] sm:$0xff] (!%p912_p9), %v1539_v0  ;;  %295 = vst [vmem:[#allocation2 + $0x8] sm:$0xff] (!%p912_p9), %v1539_v0 }
  0xa7   : > { %296 = vst [vmem:[#allocation2 + $0x10] sm:$0xff] (!%p912_p9), %v1539_v0  ;;  %297 = vst [vmem:[#allocation2 + $0x18] sm:$0xff] (!%p912_p9), %v1539_v0 }
  0xa8   : > { %298 = vst [vmem:[#allocation2 + $0x20] sm:$0xff] (!%p912_p9), %v1539_v0  ;;  %299 = vst [vmem:[#allocation2 + $0x28] sm:$0xff] (!%p912_p9), %v1539_v0 }
  0xa9   : > { %300 = vst [vmem:[#allocation2 + $0x30] sm:$0xff] (!%p912_p9), %v1539_v0  ;;  %301 = vst [vmem:[#allocation2 + $0x38] sm:$0xff] (!%p912_p9), %v1539_v0 }
  0xaa   : > { %302 = vst [vmem:[#allocation2 + $0x40] sm:$0xff] (!%p912_p9), %v1539_v0  ;;  %303 = vst [vmem:[#allocation2 + $0x48] sm:$0xff] (!%p912_p9), %v1539_v0 }
  0xab   : > { %304 = vst [vmem:[#allocation2 + $0x50] sm:$0xff] (!%p912_p9), %v1539_v0  ;;  %305 = vst [vmem:[#allocation2 + $0x58] sm:$0xff] (!%p912_p9), %v1539_v0 }
  0xac   : > { %306 = vst [vmem:[#allocation2 + $0x60] sm:$0xff] (!%p912_p9), %v1539_v0  ;;  %307 = vst [vmem:[#allocation2 + $0x68] sm:$0xff] (!%p912_p9), %v1539_v0 }
  0xad   : > { %308 = vst [vmem:[#allocation2 + $0x70] sm:$0xff] %v1539_v0  ;;  %309 = vst [vmem:[#allocation2 + $0x78] sm:$0xff] %v1539_v0 }
  0xae PF: > { %v342_v1 = vld [vmem:[%s1849_s29] sm:$0xff]  ;;  %v343_v2 = vld [vmem:[%s1849_s29 + $0x8] sm:$0xff]  ;;  %v344_v3 = vld [vmem:[%s1849_s29 + $0x10] sm:$0xff]  ;;  %s2061_s15 = sld [smem:[#allocation16_spill]] }
  0xaf   : > { %v358_v4 = vpack.c.bf16 %v343_v2, %v342_v1  ;;  %v345_v5 = vld [vmem:[%s1849_s29 + $0x18] sm:$0xff]  ;;  %v346_v7 = vld [vmem:[%s1849_s29 + $0x20] sm:$0xff]  ;;  %v347_v8 = vld [vmem:[%s1849_s29 + $0x28] sm:$0xff] }
  0xb0   : > { %v359_v6 = vpack.c.bf16 %v345_v5, %v344_v3  ;;  %v348_v9 = vld [vmem:[%s1849_s29 + $0x30] sm:$0xff]  ;;  %v360_v10 = vpack.c.bf16 %v347_v8, %v346_v7  ;;  %v349_v11 = vld [vmem:[%s1849_s29 + $0x38] sm:$0xff]  ;;  %v1280_v12 = vld [vmem:[%s1841_s25] sm:$0xff]  }
  0xb1   : > { %979 = vmatprep.subr.bf16.mxu0 %v358_v4  ;;  %1099 = vmatprep.subr.bf16.mxu1 %v358_v4  ;;  %v1281_v13 = vld [vmem:[%s1841_s25 + $0x20] sm:$0xff]   ;;  %v361_v14 = vpack.c.bf16 %v349_v11, %v348_v9  ;;  %v351_v16 = vld [vmem:[%s1849_s29 + $0x48] sm:$0xff]  ;;  %v352_v18 = vld [vmem:[%s1849_s29 + $0x50] sm:$0xff] }
  0xb2   : > { %980 = vmatpush3.bf16.msra.mxu0 %v358_v4  ;;  %1107 = vmatpush3.bf16.msra.mxu1 %v358_v4  ;;  %v350_v15 = vld [vmem:[%s1849_s29 + $0x40] sm:$0xff]  ;;  %v353_v19 = vld [vmem:[%s1849_s29 + $0x58] sm:$0xff]  ;;  %v355_v22 = vld [vmem:[%s1849_s29 + $0x68] sm:$0xff] }
  0xb3   : > { %981 = vmatprep.subr.bf16.mxu0 %v359_v6  ;;  %1100 = vmatprep.subr.bf16.mxu1 %v359_v6  ;;  %v362_v17 = vpack.c.bf16 %v351_v16, %v350_v15  ;;  %v363_v20 = vpack.c.bf16 %v353_v19, %v352_v18  ;;  %v354_v21 = vld [vmem:[%s1849_s29 + $0x60] sm:$0xff]  ;;  %v356_v24 = vld [vmem:[%s1849_s29 + $0x70] sm:$0xff]  ;;  %v357_v25 = vld [vmem:[%s1849_s29 + $0x78] sm:$0xff] }
  0xb4   : > { %995 = vmatprep.mubr.bf16.mxu0 %v1280_v12  ;;  %1003 = vmatprep.mubr.bf16.mxu1 %v1281_v13  ;;  %v364_v23 = vpack.c.bf16 %v355_v22, %v354_v21  ;;  %v365_v26 = vpack.c.bf16 %v357_v25, %v356_v24  ;;  %v1282_v27 = vld [vmem:[%s1841_s25 + $0x8] sm:$0xff]   ;;  %v1284_v29 = vld [vmem:[%s1841_s25 + $0x10] sm:$0xff]   ;;  %v1286_v31 = vld [vmem:[%s1841_s25 + $0x18] sm:$0xff]   ;;  %p921_p5 = scmp.ne.s32.totalorder %s2061_s15, 1 }
  0xb5   : > { %v1283_v28 = vld [vmem:[%s1841_s25 + $0x28] sm:$0xff]   ;;  %v1285_v30 = vld [vmem:[%s1841_s25 + $0x30] sm:$0xff]   ;;  %v1287_v32 = vld [vmem:[%s1841_s25 + $0x38] sm:$0xff]   ;;  %s2062_s14 = sld [smem:[#allocation25_spill]] (!%p921_p5) }
  0xb6   : > { %982 = vmatpush3.bf16.msra.mxu0 %v359_v6  ;;  %1108 = vmatpush3.bf16.msra.mxu1 %v359_v6  ;;  %v312_v33 = vld [vmem:[#allocation2 + $0x10] sm:$0xff]  ;;  %v310_v35 = vld [vmem:[#allocation2] sm:$0xff]  ;;  %v313_v39 = vld [vmem:[#allocation2 + $0x18] sm:$0xff] }
  0xb7   : > { %983 = vmatprep.subr.bf16.mxu0 %v360_v10  ;;  %1101 = vmatprep.subr.bf16.mxu1 %v360_v10  ;;  %v320_v34 = vld [vmem:[#allocation2 + $0x50] sm:$0xff]  ;;  %v318_v36 = vld [vmem:[#allocation2 + $0x40] sm:$0xff]  ;;  %v321_v40 = vld [vmem:[#allocation2 + $0x58] sm:$0xff] }
  0xb8   : > { %v311_v45 = vld [vmem:[#allocation2 + $0x8] sm:$0xff]  ;;  %v316_v57 = vld [vmem:[#allocation2 + $0x30] sm:$0xff]  ;;  %v314_v59 = vld [vmem:[#allocation2 + $0x20] sm:$0xff] }
  0xb9   : > { %v319_v46 = vld [vmem:[#allocation2 + $0x48] sm:$0xff]  ;;  %v324_v58 = vld [vmem:[#allocation2 + $0x70] sm:$0xff]  ;;  %v322_v60 = vld [vmem:[#allocation2 + $0x60] sm:$0xff] }
  0xba   : > { %984 = vmatpush3.bf16.msra.mxu0 %v360_v10  ;;  %1109 = vmatpush3.bf16.msra.mxu1 %v360_v10  ;;  %v317_v63 = vld [vmem:[#allocation2 + $0x38] sm:$0xff]  ;;  %v315_v5 = vld [vmem:[#allocation2 + $0x28] sm:$0xff]  ;;  %v565_v19 = vld [vmem:[#allocation8 + $0x10] sm:$0xff] (!%p921_p5) }
  0xbb   : > { %985 = vmatprep.subr.bf16.mxu0 %v361_v14  ;;  %1102 = vmatprep.subr.bf16.mxu1 %v361_v14  ;;  %v325_v0 = vld [vmem:[#allocation2 + $0x78] sm:$0xff]  ;;  %v323_v6 = vld [vmem:[#allocation2 + $0x68] sm:$0xff] }
  0xbc   : > { %v564_v18 = vld [vmem:[#allocation8 + $0x8] sm:$0xff] (!%p921_p5)  ;;  %v566_v21 = vld [vmem:[#allocation8 + $0x18] sm:$0xff] (!%p921_p5) }
  0xbd   : > { %v1071_v22 = vpack.c.bf16 (!%p921_p5), %v566_v21, %v565_v19  ;;  %v568_v24 = vld [vmem:[#allocation8 + $0x28] sm:$0xff] (!%p921_p5) }
  0xbe   : > { %986 = vmatpush3.bf16.msra.mxu0 %v361_v14  ;;  %1110 = vmatpush3.bf16.msra.mxu1 %v361_v14 }
  0xbf   : > { %987 = vmatprep.subr.bf16.mxu0 %v362_v17  ;;  %1103 = vmatprep.subr.bf16.mxu1 %v362_v17 }
  0xc2   : > { %988 = vmatpush3.bf16.msra.mxu0 %v362_v17  ;;  %1111 = vmatpush3.bf16.msra.mxu1 %v362_v17  ;;  %v563_v17 = vld [vmem:[#allocation8] sm:$0xff] (!%p921_p5) }
  0xc3   : > { %989 = vmatprep.subr.bf16.mxu0 %v363_v20  ;;  %1104 = vmatprep.subr.bf16.mxu1 %v363_v20 }
  0xc6   : > { %990 = vmatpush3.bf16.msra.mxu0 %v363_v20  ;;  %1112 = vmatpush3.bf16.msra.mxu1 %v363_v20  ;;  %v1067_v20 = vpack.c.bf16 (!%p921_p5), %v564_v18, %v563_v17 }
  0xc7   : > { %991 = vmatprep.subr.bf16.mxu0 %v364_v23  ;;  %1105 = vmatprep.subr.bf16.mxu1 %v364_v23 }
  0xca   : > { %992 = vmatpush3.bf16.msra.mxu0 %v364_v23  ;;  %1113 = vmatpush3.bf16.msra.mxu1 %v364_v23  ;;  %v567_v23 = vld [vmem:[#allocation8 + $0x20] sm:$0xff] (!%p921_p5) }
  0xcb   : > { %993 = vmatprep.subr.bf16.mxu0 %v365_v26  ;;  %1106 = vmatprep.subr.bf16.mxu1 %v365_v26  ;;  %v1075_v25 = vpack.c.bf16 (!%p921_p5), %v568_v24, %v567_v23 }
  0xce   : > { %994 = vmatpush3.bf16.msra.mxu0 %v365_v26  ;;  %1114 = vmatpush3.bf16.msra.mxu1 %v365_v26 }
  0xcf   : > { %1068 = vmatprep.subr.bf16.mxu0 (!%p921_p5), %v1067_v20  ;;  %1115 = vmatprep.subr.bf16.mxu1 (!%p921_p5), %v1067_v20 }
  0xd1   : > { %996 = vmatmul.mubr.bf16.vlgmr.msra.gmra.mrb[0].mxu0 %v1282_v27  ;;  %1004 = vmatmul.mubr.bf16.vlgmr.msra.gmra.mrb[0].mxu1 %v1283_v28  ;;  %v569_v28 = vld [vmem:[#allocation8 + $0x30] sm:$0xff] (!%p921_p5) }
  0xd2   : > { %999 = vmatprep.mubr.bf16.mxu0 %v1284_v29  ;;  %1007 = vmatprep.mubr.bf16.mxu1 %v1285_v30  ;;  %v570_v29 = vld [vmem:[#allocation8 + $0x38] sm:$0xff] (!%p921_p5) }
  0xd3   : > { %1070 = vmatpush3.bf16.msra.mxu0 (!%p921_p5), %v1067_v20  ;;  %1123 = vmatpush3.bf16.msra.mxu1 (!%p921_p5), %v1067_v20  ;;  %v1079_v30 = vpack.c.bf16 (!%p921_p5), %v570_v29, %v569_v28 }
  0xd4   : > { %1072 = vmatprep.subr.bf16.mxu0 (!%p921_p5), %v1071_v22  ;;  %1116 = vmatprep.subr.bf16.mxu1 (!%p921_p5), %v1071_v22 }
  0xd7   : > { %1074 = vmatpush3.bf16.msra.mxu0 (!%p921_p5), %v1071_v22  ;;  %1124 = vmatpush3.bf16.msra.mxu1 (!%p921_p5), %v1071_v22 }
  0xd8   : > { %1076 = vmatprep.subr.bf16.mxu0 (!%p921_p5), %v1075_v25  ;;  %1117 = vmatprep.subr.bf16.mxu1 (!%p921_p5), %v1075_v25 }
  0xd9   : > { %1000 = vmatmul.mubr.bf16.gmra.mrb[4].mxu0 %v1286_v31  ;;  %1008 = vmatmul.mubr.bf16.gmra.mrb[4].mxu1 %v1287_v32  ;;  %v571_v31 = vld [vmem:[#allocation8 + $0x40] sm:$0xff] (!%p921_p5)  ;;  %v572_v32 = vld [vmem:[#allocation8 + $0x48] sm:$0xff] (!%p921_p5) }
  0xdb   : > { %1078 = vmatpush3.bf16.msra.mxu0 (!%p921_p5), %v1075_v25  ;;  %1125 = vmatpush3.bf16.msra.mxu1 (!%p921_p5), %v1075_v25 }
  0xdc   : > { %1080 = vmatprep.subr.bf16.mxu0 (!%p921_p5), %v1079_v30  ;;  %1118 = vmatprep.subr.bf16.mxu1 (!%p921_p5), %v1079_v30 }
  0xdf   : > { %1082 = vmatpush3.bf16.msra.mxu0 (!%p921_p5), %v1079_v30  ;;  %1126 = vmatpush3.bf16.msra.mxu1 (!%p921_p5), %v1079_v30 }
 0x1a4   : > { %v997_v37 = vpop.f32.mrb[0].mxu0  ;;  %v1005_v38 = vpop.f32.mrb[0].mxu1 }
 0x1a5   : > { %v513_v41 = vadd.f32 %v997_v37, %v312_v33  ;;  %v521_v42 = vadd.f32 %v1005_v38, %v320_v34  ;;  %v448_v43 = vpop.f32.mrb[1].mxu0  ;;  %v480_v44 = vpop.f32.mrb[1].mxu1  ;;  %v1083_v33 = vpack.c.bf16 (!%p921_p5), %v572_v32, %v571_v31  ;;  %v573_v34 = vld [vmem:[#allocation8 + $0x50] sm:$0xff] (!%p921_p5)  ;;  %v575_v37 = vld [vmem:[#allocation8 + $0x60] sm:$0xff] (!%p921_p5)  ;;  %v576_v38 = vld [vmem:[#allocation8 + $0x68] sm:$0xff] (!%p921_p5) }
 0x1a6   : > { %v511_v47 = vadd.f32 %v448_v43, %v310_v35  ;;  %v519_v48 = vadd.f32 %v480_v44, %v318_v36  ;;  %v998_v49 = vpop.f32.mrb[2].mxu0  ;;  %v1006_v50 = vpop.f32.mrb[2].mxu1  ;;  %v574_v35 = vld [vmem:[#allocation8 + $0x58] sm:$0xff] (!%p921_p5) }
 0x1a7   : > { %529 = vst [vmem:[#allocation2 + $0x10] sm:$0xff] %v513_v41  ;;  %537 = vst [vmem:[#allocation2 + $0x50] sm:$0xff] %v521_v42  ;;  %v514_v51 = vadd.f32 %v998_v49, %v313_v39  ;;  %v522_v52 = vadd.f32 %v1006_v50, %v321_v40  ;;  %v451_v53 = vpop.f32.mrb[3].mxu0  ;;  %v483_v54 = vpop.f32.mrb[3].mxu1  ;;  %1084 = vmatprep.subr.bf16.mxu0 (!%p921_p5), %v1083_v33  ;;  %1119 = vmatprep.subr.bf16.mxu1 (!%p921_p5), %v1083_v33  ;;  %v577_v40 = vld [vmem:[#allocation8 + $0x70] sm:$0xff] (!%p921_p5)  ;;  %v578_v41 = vld [vmem:[#allocation8 + $0x78] sm:$0xff] (!%p921_p5) }
 0x1a8   : > { %527 = vst [vmem:[#allocation2] sm:$0xff] %v511_v47  ;;  %535 = vst [vmem:[#allocation2 + $0x40] sm:$0xff] %v519_v48  ;;  %v512_v55 = vadd.f32 %v451_v53, %v311_v45  ;;  %v520_v56 = vadd.f32 %v483_v54, %v319_v46  ;;  %v1087_v36 = vpack.c.bf16 (!%p921_p5), %v574_v35, %v573_v34  ;;  %1086 = vmatpush3.bf16.msra.mxu0 (!%p921_p5), %v1083_v33 }
 0x1a9   : > { %530 = vst [vmem:[#allocation2 + $0x18] sm:$0xff] %v514_v51  ;;  %538 = vst [vmem:[#allocation2 + $0x58] sm:$0xff] %v522_v52  ;;  %1127 = vmatpush3.bf16.msra.mxu1 (!%p921_p5), %v1083_v33  ;;  %v1091_v39 = vpack.c.bf16 (!%p921_p5), %v576_v38, %v575_v37  ;;  %v1095_v42 = vpack.c.bf16 (!%p921_p5), %v578_v41, %v577_v40 }
 0x1aa   : > { %528 = vst [vmem:[#allocation2 + $0x8] sm:$0xff] %v512_v55  ;;  %536 = vst [vmem:[#allocation2 + $0x48] sm:$0xff] %v520_v56  ;;  %1088 = vmatprep.subr.bf16.mxu0 (!%p921_p5), %v1087_v36  ;;  %1120 = vmatprep.subr.bf16.mxu1 (!%p921_p5), %v1087_v36 }
 0x1ac   : > { %v1001_v61 = vpop.f32.mrb[4].mxu0  ;;  %v1009_v62 = vpop.f32.mrb[4].mxu1  ;;  %546 = sbr.rel (%p921_p5) target bundleno = 670 (0x29e), region = 56  ;;  %1090 = vmatpush3.bf16.msra.mxu0 (!%p921_p5), %v1087_v36 }
 0x1ad   : > { %v517_v1 = vadd.f32 %v1001_v61, %v316_v57  ;;  %v525_v2 = vadd.f32 %v1009_v62, %v324_v58  ;;  %v464_v3 = vpop.f32.mrb[5].mxu0  ;;  %v496_v4 = vpop.f32.mrb[5].mxu1  ;;  %1128 = vmatpush3.bf16.msra.mxu1 (!%p921_p5), %v1087_v36  ;;  %1092 = vmatprep.subr.bf16.mxu0 (!%p921_p5), %v1091_v39  ;;  %v922_v57 = vld [vmem:[%s2062_s14] ss:$0 sm:$0xff] (!%p921_p5) }
 0x1ae   : > { %v515_v7 = vadd.f32 %v464_v3, %v314_v59  ;;  %v523_v8 = vadd.f32 %v496_v4, %v322_v60  ;;  %v1002_v9 = vpop.f32.mrb[6].mxu0  ;;  %v1010_v10 = vpop.f32.mrb[6].mxu1  ;;  %1121 = vmatprep.subr.bf16.mxu1 (!%p921_p5), %v1091_v39  ;;  %v549_v45 = vld [vmem:[#allocation2 + $0x10] sm:$0xff] (!%p921_p5) }
 0x1af   : > { %533 = vst [vmem:[#allocation2 + $0x30] sm:$0xff] %v517_v1  ;;  %541 = vst [vmem:[#allocation2 + $0x70] sm:$0xff] %v525_v2  ;;  %v518_v11 = vadd.f32 %v1002_v9, %v317_v63  ;;  %v526_v12 = vadd.f32 %v1010_v10, %v325_v0  ;;  %v467_v13 = vpop.f32.mrb[7].mxu0  ;;  %v499_v14 = vpop.f32.mrb[7].mxu1  ;;  %v547_v26 = vld [vmem:[#allocation2] sm:$0xff] (!%p921_p5)  ;;  %v557_v46 = vld [vmem:[#allocation2 + $0x50] sm:$0xff] (!%p921_p5) }
 0x1b0   : > { %531 = vst [vmem:[#allocation2 + $0x20] sm:$0xff] %v515_v7  ;;  %539 = vst [vmem:[#allocation2 + $0x60] sm:$0xff] %v523_v8  ;;  %v516_v15 = vadd.f32 %v467_v13, %v315_v5  ;;  %v524_v16 = vadd.f32 %v499_v14, %v323_v6  ;;  %v555_v27 = vld [vmem:[#allocation2 + $0x40] sm:$0xff] (!%p921_p5)  ;;  %1043 = vmatprep.mubr.f32.mxu0 (!%p921_p5), %v547_v26  ;;  %1094 = vmatpush3.bf16.msra.mxu0 (!%p921_p5), %v1091_v39  ;;  %v550_v47 = vld [vmem:[#allocation2 + $0x18] sm:$0xff] (!%p921_p5) }
 0x1b1   : > { %534 = vst [vmem:[#allocation2 + $0x38] sm:$0xff] %v518_v11  ;;  %542 = vst [vmem:[#allocation2 + $0x78] sm:$0xff] %v526_v12  ;;  %1055 = vmatprep.mubr.f32.mxu1 (!%p921_p5), %v555_v27  ;;  %1129 = vmatpush3.bf16.msra.mxu1 (!%p921_p5), %v1091_v39  ;;  %v548_v43 = vld [vmem:[#allocation2 + $0x8] sm:$0xff] (!%p921_p5)  ;;  %v558_v48 = vld [vmem:[#allocation2 + $0x58] sm:$0xff] (!%p921_p5) }
 0x1b2   : > { %532 = vst [vmem:[#allocation2 + $0x28] sm:$0xff] %v516_v15  ;;  %540 = vst [vmem:[#allocation2 + $0x68] sm:$0xff] %v524_v16  ;;  %1096 = vmatprep.subr.bf16.mxu0 (!%p921_p5), %v1095_v42  ;;  %1122 = vmatprep.subr.bf16.mxu1 (!%p921_p5), %v1095_v42  ;;  %v556_v44 = vld [vmem:[#allocation2 + $0x48] sm:$0xff] (!%p921_p5) }
 0x1b4   : > { %1098 = vmatpush3.bf16.msra.mxu0 %v1095_v42 }
 0x1b5   : > { %1130 = vmatpush3.bf16.msra.mxu1 %v1095_v42 }
 0x1b6   : > { %v553_v53 = vld [vmem:[#allocation2 + $0x30] sm:$0xff] }
 0x1b7   : > { %1044 = vmatmul.mubr.f32.vlgmr.msra.gmra.mrb[0].mxu0 %v548_v43  ;;  %v551_v49 = vld [vmem:[#allocation2 + $0x20] sm:$0xff]  ;;  %v561_v54 = vld [vmem:[#allocation2 + $0x70] sm:$0xff] }
 0x1b8   : > { %1056 = vmatmul.mubr.f32.vlgmr.msra.gmra.mrb[0].mxu1 %v556_v44  ;;  %1046 = vmatprep.mubr.f32.mxu0 %v549_v45  ;;  %v559_v50 = vld [vmem:[#allocation2 + $0x60] sm:$0xff]  ;;  %v554_v55 = vld [vmem:[#allocation2 + $0x38] sm:$0xff] }
 0x1b9   : > { %1058 = vmatprep.mubr.f32.mxu1 %v557_v46  ;;  %v552_v51 = vld [vmem:[#allocation2 + $0x28] sm:$0xff]  ;;  %v562_v56 = vld [vmem:[#allocation2 + $0x78] sm:$0xff] }
 0x1ba   : > { %v560_v52 = vld [vmem:[#allocation2 + $0x68] sm:$0xff] }
 0x1bb   : > { %1047 = vmatmul.mubr.f32.gmra.mrb[2].mxu0 %v550_v47 }
 0x1bc   : > { %1059 = vmatmul.mubr.f32.gmra.mrb[2].mxu1 %v558_v48  ;;  %1049 = vmatprep.mubr.f32.mxu0 %v551_v49 }
 0x1bd   : > { %1061 = vmatprep.mubr.f32.mxu1 %v559_v50 }
 0x1bf   : > { %1050 = vmatmul.mubr.f32.gmra.mrb[4].mxu0 %v552_v51 }
 0x1c0   : > { %1062 = vmatmul.mubr.f32.gmra.mrb[4].mxu1 %v560_v52  ;;  %1052 = vmatprep.mubr.f32.mxu0 %v553_v53 }
 0x1c1   : > { %1064 = vmatprep.mubr.f32.mxu1 %v561_v54 }
 0x1c3   : > { %1053 = vmatmul.mubr.f32.gmra.mrb[6].mxu0 %v554_v55 }
 0x1c4   : > { %1065 = vmatmul.mubr.f32.gmra.mrb[6].mxu1 %v562_v56 }
 0x28a   : > { %v1045_v58 = vpop.f32.mrb[0].mxu0 }
 0x28b   : > { %v1057_v59 = vpop.f32.mrb[0].mxu1  ;;  %v658_v60 = vadd.f32 %v1045_v58, %v922_v57  ;;  %v652_v62 = vpop.f32.mrb[1].mxu0 }
 0x28c   : > { %v698_v61 = vadd.f32 %v1057_v59, %v922_v57  ;;  %v692_v63 = vpop.f32.mrb[1].mxu1  ;;  %v653_v0 = vadd.f32 %v922_v57, %v652_v62 }
 0x28d   : > { %v693_v1 = vadd.f32 %v922_v57, %v692_v63  ;;  %v732_v2 = vmax.f32 %v658_v60, 0.0 }
 0x28e   : > { %v740_v3 = vmax.f32 %v698_v61, 0.0  ;;  %v731_v4 = vmax.f32 %v653_v0, 0.0  ;;  %v1048_v6 = vpop.f32.mrb[2].mxu0 }
 0x28f   : > { %v739_v5 = vmax.f32 %v693_v1, 0.0  ;;  %v1060_v7 = vpop.f32.mrb[2].mxu1  ;;  %748 = vst [vmem:[%s1862_s12 + $0x8] sm:$0xff] %v732_v2  ;;  %v668_v8 = vadd.f32 %v1048_v6, %v922_v57  ;;  %v662_v10 = vpop.f32.mrb[3].mxu0 }
 0x290   : > { %756 = vst [vmem:[%s1862_s12 + $0x48] sm:$0xff] %v740_v3  ;;  %v708_v9 = vadd.f32 %v1060_v7, %v922_v57  ;;  %v702_v11 = vpop.f32.mrb[3].mxu1  ;;  %747 = vst [vmem:[%s1862_s12] sm:$0xff] %v731_v4  ;;  %v663_v12 = vadd.f32 %v922_v57, %v662_v10 }
 0x291   : > { %755 = vst [vmem:[%s1862_s12 + $0x40] sm:$0xff] %v739_v5  ;;  %v703_v13 = vadd.f32 %v922_v57, %v702_v11  ;;  %v734_v14 = vmax.f32 %v668_v8, 0.0 }
 0x292   : > { %v742_v15 = vmax.f32 %v708_v9, 0.0  ;;  %v733_v16 = vmax.f32 %v663_v12, 0.0  ;;  %v1051_v18 = vpop.f32.mrb[4].mxu0 }
 0x293   : > { %v741_v17 = vmax.f32 %v703_v13, 0.0  ;;  %v1063_v19 = vpop.f32.mrb[4].mxu1  ;;  %750 = vst [vmem:[%s1862_s12 + $0x18] sm:$0xff] %v734_v14  ;;  %v678_v20 = vadd.f32 %v1051_v18, %v922_v57  ;;  %v672_v22 = vpop.f32.mrb[5].mxu0 }
 0x294   : > { %758 = vst [vmem:[%s1862_s12 + $0x58] sm:$0xff] %v742_v15  ;;  %v718_v21 = vadd.f32 %v1063_v19, %v922_v57  ;;  %v712_v23 = vpop.f32.mrb[5].mxu1  ;;  %749 = vst [vmem:[%s1862_s12 + $0x10] sm:$0xff] %v733_v16  ;;  %v673_v24 = vadd.f32 %v922_v57, %v672_v22 }
 0x295   : > { %757 = vst [vmem:[%s1862_s12 + $0x50] sm:$0xff] %v741_v17  ;;  %v713_v25 = vadd.f32 %v922_v57, %v712_v23  ;;  %v736_v26 = vmax.f32 %v678_v20, 0.0 }
 0x296   : > { %v744_v27 = vmax.f32 %v718_v21, 0.0  ;;  %v735_v28 = vmax.f32 %v673_v24, 0.0  ;;  %v1054_v30 = vpop.f32.mrb[6].mxu0 }
 0x297   : > { %v743_v29 = vmax.f32 %v713_v25, 0.0  ;;  %v1066_v31 = vpop.f32.mrb[6].mxu1  ;;  %752 = vst [vmem:[%s1862_s12 + $0x28] sm:$0xff] %v736_v26  ;;  %v688_v32 = vadd.f32 %v1054_v30, %v922_v57  ;;  %v682_v34 = vpop.f32.mrb[7].mxu0 }
 0x298   : > { %760 = vst [vmem:[%s1862_s12 + $0x68] sm:$0xff] %v744_v27  ;;  %v728_v33 = vadd.f32 %v1066_v31, %v922_v57  ;;  %v722_v35 = vpop.f32.mrb[7].mxu1  ;;  %751 = vst [vmem:[%s1862_s12 + $0x20] sm:$0xff] %v735_v28  ;;  %v683_v36 = vadd.f32 %v922_v57, %v682_v34 }
 0x299   : > { %759 = vst [vmem:[%s1862_s12 + $0x60] sm:$0xff] %v743_v29  ;;  %v723_v37 = vadd.f32 %v922_v57, %v722_v35  ;;  %v738_v38 = vmax.f32 %v688_v32, 0.0 }
 0x29a   : > { %v746_v39 = vmax.f32 %v728_v33, 0.0  ;;  %v737_v40 = vmax.f32 %v683_v36, 0.0 }
 0x29b   : > { %v745_v41 = vmax.f32 %v723_v37, 0.0  ;;  %754 = vst [vmem:[%s1862_s12 + $0x38] sm:$0xff] %v738_v38 }
 0x29c   : > { %762 = vst [vmem:[%s1862_s12 + $0x78] sm:$0xff] %v746_v39  ;;  %753 = vst [vmem:[%s1862_s12 + $0x30] sm:$0xff] %v737_v40 }
 0x29d   : > { %761 = vst [vmem:[%s1862_s12 + $0x70] sm:$0xff] %v745_v41 }
 0x29e PF: > { %s2063_s8 = sld [smem:[#allocation17_spill]]  ;;  %s2065_s13 = sld [smem:[#allocation20_spill]] }
 0x29f   : > { %s2066_s16 = sld [smem:[#allocation26_spill]]  ;;  %s777_s6 = sshll.u32 %s1862_s12, 4  ;;  %s1916_s6 = int_to_ptr.vmem [resolvable:$true] %s777_s6 }
 0x2a0   : > { %s1920_s5 = scalar_lea.sflag [#allocation5], %s283_s2  ;;  %s1376_s11 = scalar_lea.vmem %s1916_s6, 2048 }
 0x2a1   : > { %p1377_p2 = scmp.ne.s32.totalorder %s1916_s6, %s1376_s11  ;;  %s1540_s15 = smov [#allocation9]  }
 0x2a2   : > { %s1380_s24 = sshll.u32 %s1540_s15, 4  ;;  %s1381_s24 = int_to_ptr.vmem [resolvable:$false] %s1380_s24 }
 0x2a3   : > { %s1382_s3 = scalar_lea.vmem %s1381_s24, 4096  ;;  %p1383_p4 = scmp.lt.s32.totalorder %s1916_s6, %s1381_s24 }
 0x2a4   : > { %s930_s9 = sshll.u32 %s2063_s8, 11  ;;  %p2068_p10 = scmp.ne.s32.totalorder %s2065_s13, 0 }
 0x2a5   : > { %s2067_s10 = smov %s2066_s16  ;;  %s1913_s29 = scalar_lea.hbm %s2066_s16, %s930_s9 }
 0x2a6   : > { %p1378_p7 = pnand %p1377_p2, %p2068_p10  ;;  %p1384_p8 = scmp.lt.s32.totalorder %s1382_s3, %s1376_s11 }
 0x2a8   : > { %p1379_p0 = pneg %p1378_p7  ;;  %p1385_p12 = por %p1384_p8, %p1383_p4 }
 0x2aa   : > { %p1386_p13 = pnand %p1385_p12, %p1379_p0 }
 0x2ac   : > { %1389 = shalt.err (!%p1386_p13)
}
 0x2ad   : > { %s1390_s2 = scalar_lea.hbm %s1913_s29, 2048  ;;  %s1394_s8 = scalar_lea.hbm %s2067_s10, 4096 }
 0x2ae   : > { %p1391_p6 = scmp.ne.s32.totalorder %s1913_s29, %s1390_s2  ;;  %p1395_p3 = scmp.lt.u32.totalorder %s1913_s29, %s2067_s10 }
 0x2af   : > { %p1396_p9 = scmp.lt.u32.totalorder %s1394_s8, %s1390_s2  ;;  %p1398_p2 = scmp.lt.u32.totalorder %s1390_s2, %s1913_s29 }
 0x2b0   : > { %p1392_p11 = pnand %p1391_p6, %p2068_p10 }
 0x2b1   : > { %p1397_p5 = por %p1396_p9, %p1395_p3 }
 0x2b2   : > { %p1393_p1 = pneg %p1392_p11 }
 0x2b3   : > { %p1399_p7 = por %p1398_p2, %p1397_p5 }
 0x2b5   : > { %p1400_p0 = pnand %p1399_p7, %p1393_p1 }
 0x2b7   : > { %1403 = shalt.err (!%p1400_p0)
}
 0x2b8   : > { %s1541_s30 = smov 128   ;;  %s1542_s0 = smov 8  }
 0x2b9   : > { %1139 = dma.vmem_to_hbm [thread:$0]  (%p2068_p10), %s1916_s6, 2048, %s1913_s29, %s1920_s5, %s1541_s30, %s1541_s30, %s1542_s0  }
 0x2ba PF: > { %s2069_s16 = sld [smem:[#allocation14_spill]]  ;;  %s2070_s11 = sld [smem:[#allocation21_spill]] }
 0x2bb   : > { %p1159_p4 = scmp.ge.s32.totalorder %s1530_s28, 2 }
 0x2c0   : > { %s792_s15 = sand.u32 1, %s2069_s16   ;;  %p2071_p8 = scmp.ne.s32.totalorder %s2070_s11, 0 }
 0x2c1   : > { %s793_s24 = scalar_lea.sflag [#allocation5], %s792_s15 }
 0x2c2   : > { %p1153_p12 = pnand %p1159_p4, %p2071_p8 }
 0x2c4   : > { %1473 = dma.done.wait (!%p1153_p12), %s793_s24, 2048  }
 0x2c5   : > { %1475 = vsyncadd (!%p1153_p12), %s793_s24, 4294965248  ;;  %s23_s28 = sadd.s32 1, %s1530_s28   ;;  %s2073_s15 = sld [smem:[#allocation15_spill]] }
 0x2c6   : > { %p1949_p13 = scmp.ge.s32.totalorder %s23_s28, 6   ;;  %s2074_s13 = sld [smem:[#allocation22_spill]] }
 0x2c7   : > { %s2075_s29 = smov %s2093_s21  ;;  %s2076_s16 = smov %s1486_s17 }
 0x2c8   : > { %s2077_s17 = smov %s1731_s18  ;;  %s2078_s18 = smov %s1494_s19 }
 0x2c9   : > { %s2079_s19 = smov %s1498_s20  ;;  %s2080_s20 = smov %s1787_s7 }
 0x2ca   : > { %s2081_s21 = smov %s1506_s22  ;;  %s2082_s22 = smov %s1510_s23 }
 0x2cb   : > { %s2083_s23 = smov %s1734_s4  ;;  %s2084_s24 = smov %s1522_s26 }
 0x2cc   : > { %s2085_s25 = smov %s1526_s27  ;;  %s2086_s26 = smov %s2074_s13 }
 0x2cd   : > { %s2087_s27 = smov %s2075_s29  ;;  %22 = sbr.rel (!%p1949_p13) target bundleno = 17 (0x11), region = 106 }
 0x2d4   :  { %798 = vsyncpa [#allocation4], 1 }
 0x2d5   :  { %800 = vsyncpa [#allocation4 + $0x1], 1 }
 0x2d6   :  { %801 = vsyncpa [#allocation7], 1 }
 0x2d7   :  { %803 = vsyncpa [#allocation7 + $0x1], 1 }
 0x2d8   :  { %804 = vsyncpa [#allocation5], 1 }
 0x2d9   :  { %806 = vsyncpa [#allocation5 + $0x1], 1 }

</bundles_post_ra>
